<compile_context>
chip_gen: v5e
topology: v5e:2x2
jax: 0.10.0
libtpu: 0.0.40
codegen_flags: <defaults>
</compile_context>

<pallas_src>
import jax
import jax.numpy as jnp
from jax import lax
from jax.experimental import pallas as pl
from jax.experimental.pallas import tpu as pltpu


def _round_up(x, m):
    return (x + m - 1) // m * m


def encoder_rnn_kernel(x_ref, wih_ref, whh_ref, b_ref, out_ref, h_ref):
    """One time-chunk of the Elman RNN recurrence.

    Per grid step (time chunk c):
      x_ref:   (T*Bp, E)   time-major embedded inputs for this chunk
      wih_ref: (E, Hp)     W_ih^T   (zero-padded to lane-dense Hp)
      whh_ref: (Hp, Hp)    W_hh^T
      b_ref:   (1, Hp)     b_ih + b_hh   (f32)
      out_ref: (T*Bp, Hp)  per-step hidden states (also used as the x_proj slab)
      h_ref:   (Bp, Hp)    persistent VMEM scratch carrying h across chunks
    """
    Bp, Hp = h_ref.shape
    T = out_ref.shape[0] // Bp

    @pl.when(pl.program_id(0) == 0)
    def _():
        h_ref[...] = jnp.zeros_like(h_ref)

    # Hoisted input projection for the whole chunk, off the serial critical
    # path, written straight into the f32 output slab (xp scratch eliminated).
    out_ref[...] = (
        jnp.dot(x_ref[...], wih_ref[...], preferred_element_type=jnp.float32)
        + b_ref[...]
    )

    whh = whh_ref[...]  # resident for the whole chunk

    # Strictly serial recurrence: h_t = tanh(x_proj_t + h_{t-1} @ W_hh^T).
    def step(t, h_prev):
        start = pl.multiple_of(t * Bp, Bp)
        xp_t = out_ref[pl.ds(start, Bp), :]                       # (Bp, Hp) f32
        h_new = jnp.tanh(
            xp_t
            + jnp.dot(h_prev.astype(whh.dtype), whh,
                      preferred_element_type=jnp.float32)
        )
        out_ref[pl.ds(start, Bp), :] = h_new
        return h_new

    unroll = T if T <= 8 else 8
    h_ref[...] = lax.fori_loop(0, T, step, h_ref[...], unroll=unroll)


def encoder_rnn_forward(input_seq, params, *, time_chunk=None,
                        mxu_dtype=jnp.float32):
    """Equivalent of EncoderRNN.forward for cell_type='RNN', num_layers=1."""
    B, S = input_seq.shape
    E = params["embedding"].shape[1]
    H = params["W_hh"].shape[0]

    Bp = _round_up(B, 8)      # sublane-aligned batch
    Hp = _round_up(H, 128)    # lane-dense hidden

    if time_chunk is None:
        time_chunk = S
    assert S % time_chunk == 0, "time_chunk must divide the sequence length"
    n_chunks = S // time_chunk
    rows = time_chunk * Bp

    # Embedding gather (data-dependent HBM lookup) stays in plain JAX; gather
    # with transposed indices so the kernel input is already time-major.
    x_tm = params["embedding"][input_seq.T].astype(jnp.float32)      # (S, B, E)
    if Bp != B:
        x_tm = jnp.pad(x_tm, ((0, 0), (0, Bp - B), (0, 0)))
    x_flat = x_tm.reshape(S * Bp, E).astype(mxu_dtype)               # (S*Bp, E)

    wih_t = jnp.pad(params["W_ih"].T.astype(jnp.float32),
                    ((0, 0), (0, Hp - H))).astype(mxu_dtype)         # (E, Hp)
    whh_t = jnp.pad(params["W_hh"].T.astype(jnp.float32),
                    ((0, Hp - H), (0, Hp - H))).astype(mxu_dtype)    # (Hp, Hp)
    bias = jnp.pad((params["b_ih"] + params["b_hh"]).astype(jnp.float32),
                   (0, Hp - H)).reshape(1, Hp)                       # (1, Hp)

    out_flat = pl.pallas_call(
        encoder_rnn_kernel,
        out_shape=jax.ShapeDtypeStruct((S * Bp, Hp), jnp.float32),
        grid_spec=pltpu.PrefetchScalarGridSpec(
            num_scalar_prefetch=0,
            grid=(n_chunks,),
            in_specs=[
                pl.BlockSpec((rows, E), lambda c: (c, 0)),    # x chunk
                pl.BlockSpec((E, Hp), lambda c: (0, 0)),      # W_ih^T
                pl.BlockSpec((Hp, Hp), lambda c: (0, 0)),     # W_hh^T
                pl.BlockSpec((1, Hp), lambda c: (0, 0)),      # bias
            ],
            out_specs=pl.BlockSpec((rows, Hp), lambda c: (c, 0)),
            scratch_shapes=[pltpu.VMEM((Bp, Hp), jnp.float32)],  # carried h
        ),
        compiler_params=pltpu.CompilerParams(
            dimension_semantics=("arbitrary",),   # h is carried across chunks
            vmem_limit_bytes=32 * 1024 * 1024,
        ),
    )(x_flat, wih_t, whh_t, bias)

    out_sbh = out_flat.reshape(S, Bp, Hp)
    # batch_first output required by the module spec; strip padding first so
    # the transpose only touches the real (B, S, H) data.
    outputs = jnp.transpose(out_sbh[:, :B, :H], (1, 0, 2))           # (B, S, H)
    hidden = out_sbh[S - 1, :B, :H][None, ...]                       # (1, B, H)
    return outputs, hidden


def make_params(key, input_size, embed_size, hidden_size):
    """Deterministic parameter init (PyTorch-like uniform(-1/sqrt(H), 1/sqrt(H)))."""
    k0, k1, k2, k3, k4 = jax.random.split(key, 5)
    bound = 1.0 / jnp.sqrt(hidden_size)
    return {
        "embedding": jax.random.normal(k0, (input_size, embed_size), jnp.float32),
        "W_ih": jax.random.uniform(k1, (hidden_size, embed_size), jnp.float32, -bound, bound),
        "W_hh": jax.random.uniform(k2, (hidden_size, hidden_size), jnp.float32, -bound, bound),
        "b_ih": jax.random.uniform(k3, (hidden_size,), jnp.float32, -bound, bound),
        "b_hh": jax.random.uniform(k4, (hidden_size,), jnp.float32, -bound, bound),
    }


def reference_forward(input_seq, params):
    """Pure-JAX reference (lax.scan) mirroring torch.nn.RNN semantics."""
    embedded = params["embedding"][input_seq]            # (B, S, E)
    B = embedded.shape[0]
    H = params["W_hh"].shape[0]

    def step(h, x_t):
        h_new = jnp.tanh(
            x_t @ params["W_ih"].T + params["b_ih"]
            + h @ params["W_hh"].T + params["b_hh"]
        )
        return h_new, h_new

    h0 = jnp.zeros((B, H), jnp.float32)
    x_sbe = jnp.transpose(embedded, (1, 0, 2))
    h_last, outs = lax.scan(step, h0, x_sbe)
    return jnp.transpose(outs, (1, 0, 2)), h_last[None, ...]


if __name__ == "__main__":
    # Small shapes consistent with the module's forward.
    input_size = 16   # vocab
    embed_size = 16
    hidden_size = 32
    batch = 2
    seq = 8

    key = jax.random.PRNGKey(0)
    pkey, tkey = jax.random.split(key)
    params = make_params(pkey, input_size, embed_size, hidden_size)
    input_seq = jax.random.randint(tkey, (batch, seq), 0, input_size, dtype=jnp.int32)

    # time_chunk=4 -> grid of 2 time chunks, exercising the pipelined DMA and
    # the persistent hidden-state carry across grid steps.
    fwd = jax.jit(lambda s, p: encoder_rnn_forward(s, p, time_chunk=4))
    outputs, hidden = fwd(input_seq, params)
    outputs = jax.block_until_ready(outputs)
    hidden = jax.block_until_ready(hidden)

    # Correctness check against the pure-JAX reference.
    ref_out, ref_hid = reference_forward(input_seq, params)
    assert outputs.shape == (batch, seq, hidden_size)
    assert hidden.shape == (1, batch, hidden_size)
    assert jnp.allclose(outputs, ref_out, atol=1e-4, rtol=1e-4)
    assert jnp.allclose(hidden, ref_hid, atol=1e-4, rtol=1e-4)

    print("KERNEL_OK")
</pallas_src>

<mosaic_0001>
module attributes {stable_mosaic.version = 11 : i64} {
  func.func @encoder_rnn_kernel(%arg0: i32, %arg1: memref<32x16xf32, #tpu.memory_space<vmem>>, %arg2: memref<16x128xf32, #tpu.memory_space<vmem>>, %arg3: memref<128x128xf32, #tpu.memory_space<vmem>>, %arg4: memref<1x128xf32, #tpu.memory_space<vmem>>, %arg5: memref<32x128xf32, #tpu.memory_space<vmem>>, %arg6: memref<8x128xf32, #tpu.memory_space<vmem>>) attributes {dimension_semantics = [#tpu.dimension_semantics<arbitrary>], iteration_bounds = array<i64: 2>, scalar_prefetch = 0 : i64, scratch_operands = 1 : i64, tpu.core_type = #tpu.core_type<tc>, window_params = [{transform_indices = @transform_0, window_bounds = array<i64: 32, 16>}, {pipeline_mode = #tpu.pipeline_mode<synchronous>, transform_indices = @transform_1, window_bounds = array<i64: 16, 128>}, {pipeline_mode = #tpu.pipeline_mode<synchronous>, transform_indices = @transform_2, window_bounds = array<i64: 128, 128>}, {pipeline_mode = #tpu.pipeline_mode<synchronous>, transform_indices = @transform_3, window_bounds = array<i64: 1, 128>}, {transform_indices = @transform_4, window_bounds = array<i64: 32, 128>}]} {
    %c0_i32 = arith.constant 0 : i32
    %0 = arith.cmpi eq, %arg0, %c0_i32 : i32
    %1 = arith.extui %0 : i1 to i32
    %c0_i32_0 = arith.constant 0 : i32
    %2 = arith.cmpi ne, %1, %c0_i32_0 : i32
    scf.if %2 {
      %cst_30 = arith.constant 0.000000e+00 : f32
      %49 = vector.broadcast %cst_30 : f32 to vector<8x128xf32>
      %c0_31 = arith.constant 0 : index
      %c0_32 = arith.constant 0 : index
      %50 = vector.load %arg6[%c0_31, %c0_32] : memref<8x128xf32, #tpu.memory_space<vmem>>, vector<8x128xf32>
      tpu.vector_store %arg6[%c0_31, %c0_32], %49 {strides = array<i32>} : memref<8x128xf32, #tpu.memory_space<vmem>>, vector<8x128xf32>,
    } else {
    }
    %c0 = arith.constant 0 : index
    %c0_1 = arith.constant 0 : index
    %3 = vector.load %arg1[%c0, %c0_1] : memref<32x16xf32, #tpu.memory_space<vmem>>, vector<32x16xf32>
    %c0_2 = arith.constant 0 : index
    %c0_3 = arith.constant 0 : index
    %4 = vector.load %arg2[%c0_2, %c0_3] : memref<16x128xf32, #tpu.memory_space<vmem>>, vector<16x128xf32>
    %cst = arith.constant dense<0.000000e+00> : vector<32x128xf32>
    %5 = tpu.matmul %3, %4, %cst {dimension_numbers = #tpu.dot_dimension_numbers<[1], [0], [0], [1], [0, 0, 1, 1], [], []>} : vector<32x16xf32>, vector<16x128xf32>, vector<32x128xf32> -> vector<32x128xf32>
    %c0_4 = arith.constant 0 : index
    %c0_5 = arith.constant 0 : index
    %6 = vector.load %arg4[%c0_4, %c0_5] : memref<1x128xf32, #tpu.memory_space<vmem>>, vector<1x128xf32>
    %7 = vector.broadcast %6 : vector<1x128xf32> to vector<32x128xf32>
    %8 = arith.addf %5, %7 : vector<32x128xf32>
    %c0_6 = arith.constant 0 : index
    %c0_7 = arith.constant 0 : index
    %9 = vector.load %arg5[%c0_6, %c0_7] : memref<32x128xf32, #tpu.memory_space<vmem>>, vector<32x128xf32>
    tpu.vector_store %arg5[%c0_6, %c0_7], %8 {strides = array<i32>} : memref<32x128xf32, #tpu.memory_space<vmem>>, vector<32x128xf32>,
    %c0_8 = arith.constant 0 : index
    %c0_9 = arith.constant 0 : index
    %10 = vector.load %arg3[%c0_8, %c0_9] : memref<128x128xf32, #tpu.memory_space<vmem>>, vector<128x128xf32>
    %c0_10 = arith.constant 0 : index
    %c0_11 = arith.constant 0 : index
    %11 = vector.load %arg6[%c0_10, %c0_11] : memref<8x128xf32, #tpu.memory_space<vmem>>, vector<8x128xf32>
    %c0_i32_12 = arith.constant 0 : i32
    %c8_i32 = arith.constant 8 : i32
    %12 = arith.muli %c0_i32_12, %c8_i32 : i32
    %13 = tpu.assume_multiple %12, 8 : i32
    %14 = arith.index_cast %13 : i32 to index
    %c0_13 = arith.constant 0 : index
    %15 = vector.load %arg5[%14, %c0_13] : memref<32x128xf32, #tpu.memory_space<vmem>>, vector<8x128xf32>
    %cst_14 = arith.constant dense<0.000000e+00> : vector<8x128xf32>
    %16 = tpu.matmul %11, %10, %cst_14 {dimension_numbers = #tpu.dot_dimension_numbers<[1], [0], [0], [1], [0, 0, 1, 1], [], []>} : vector<8x128xf32>, vector<128x128xf32>, vector<8x128xf32> -> vector<8x128xf32>
    %17 = arith.addf %15, %16 : vector<8x128xf32>
    %18 = math.tanh %17 : vector<8x128xf32>
    %19 = arith.index_cast %13 : i32 to index
    %c0_15 = arith.constant 0 : index
    %20 = vector.load %arg5[%19, %c0_15] : memref<32x128xf32, #tpu.memory_space<vmem>>, vector<8x128xf32>
    tpu.vector_store %arg5[%19, %c0_15], %18 {strides = array<i32>} : memref<32x128xf32, #tpu.memory_space<vmem>>, vector<8x128xf32>,
    %c1_i32 = arith.constant 1 : i32
    %c8_i32_16 = arith.constant 8 : i32
    %21 = arith.muli %c1_i32, %c8_i32_16 : i32
    %22 = tpu.assume_multiple %21, 8 : i32
    %23 = arith.index_cast %22 : i32 to index
    %c0_17 = arith.constant 0 : index
    %24 = vector.load %arg5[%23, %c0_17] : memref<32x128xf32, #tpu.memory_space<vmem>>, vector<8x128xf32>
    %cst_18 = arith.constant dense<0.000000e+00> : vector<8x128xf32>
    %25 = tpu.matmul %18, %10, %cst_18 {dimension_numbers = #tpu.dot_dimension_numbers<[1], [0], [0], [1], [0, 0, 1, 1], [], []>} : vector<8x128xf32>, vector<128x128xf32>, vector<8x128xf32> -> vector<8x128xf32>
    %26 = arith.addf %24, %25 : vector<8x128xf32>
    %27 = math.tanh %26 : vector<8x128xf32>
    %28 = arith.index_cast %22 : i32 to index
    %c0_19 = arith.constant 0 : index
    %29 = vector.load %arg5[%28, %c0_19] : memref<32x128xf32, #tpu.memory_space<vmem>>, vector<8x128xf32>
    tpu.vector_store %arg5[%28, %c0_19], %27 {strides = array<i32>} : memref<32x128xf32, #tpu.memory_space<vmem>>, vector<8x128xf32>,
    %c2_i32 = arith.constant 2 : i32
    %c8_i32_20 = arith.constant 8 : i32
    %30 = arith.muli %c2_i32, %c8_i32_20 : i32
    %31 = tpu.assume_multiple %30, 8 : i32
    %32 = arith.index_cast %31 : i32 to index
    %c0_21 = arith.constant 0 : index
    %33 = vector.load %arg5[%32, %c0_21] : memref<32x128xf32, #tpu.memory_space<vmem>>, vector<8x128xf32>
    %cst_22 = arith.constant dense<0.000000e+00> : vector<8x128xf32>
    %34 = tpu.matmul %27, %10, %cst_22 {dimension_numbers = #tpu.dot_dimension_numbers<[1], [0], [0], [1], [0, 0, 1, 1], [], []>} : vector<8x128xf32>, vector<128x128xf32>, vector<8x128xf32> -> vector<8x128xf32>
    %35 = arith.addf %33, %34 : vector<8x128xf32>
    %36 = math.tanh %35 : vector<8x128xf32>
    %37 = arith.index_cast %31 : i32 to index
    %c0_23 = arith.constant 0 : index
    %38 = vector.load %arg5[%37, %c0_23] : memref<32x128xf32, #tpu.memory_space<vmem>>, vector<8x128xf32>
    tpu.vector_store %arg5[%37, %c0_23], %36 {strides = array<i32>} : memref<32x128xf32, #tpu.memory_space<vmem>>, vector<8x128xf32>,
    %c3_i32 = arith.constant 3 : i32
    %c8_i32_24 = arith.constant 8 : i32
    %39 = arith.muli %c3_i32, %c8_i32_24 : i32
    %40 = tpu.assume_multiple %39, 8 : i32
    %41 = arith.index_cast %40 : i32 to index
    %c0_25 = arith.constant 0 : index
    %42 = vector.load %arg5[%41, %c0_25] : memref<32x128xf32, #tpu.memory_space<vmem>>, vector<8x128xf32>
    %cst_26 = arith.constant dense<0.000000e+00> : vector<8x128xf32>
    %43 = tpu.matmul %36, %10, %cst_26 {dimension_numbers = #tpu.dot_dimension_numbers<[1], [0], [0], [1], [0, 0, 1, 1], [], []>} : vector<8x128xf32>, vector<128x128xf32>, vector<8x128xf32> -> vector<8x128xf32>
    %44 = arith.addf %42, %43 : vector<8x128xf32>
    %45 = math.tanh %44 : vector<8x128xf32>
    %46 = arith.index_cast %40 : i32 to index
    %c0_27 = arith.constant 0 : index
    %47 = vector.load %arg5[%46, %c0_27] : memref<32x128xf32, #tpu.memory_space<vmem>>, vector<8x128xf32>
    tpu.vector_store %arg5[%46, %c0_27], %45 {strides = array<i32>} : memref<32x128xf32, #tpu.memory_space<vmem>>, vector<8x128xf32>,
    %c4_i32 = arith.constant 4 : i32
    %c0_28 = arith.constant 0 : index
    %c0_29 = arith.constant 0 : index
    %48 = vector.load %arg6[%c0_28, %c0_29] : memref<8x128xf32, #tpu.memory_space<vmem>>, vector<8x128xf32>
    tpu.vector_store %arg6[%c0_28, %c0_29], %45 {strides = array<i32>} : memref<8x128xf32, #tpu.memory_space<vmem>>, vector<8x128xf32>,
    return
  }
  func.func @transform_0(%arg0: i32) -> (i32, i32) {
    %c0_i32 = arith.constant 0 : i32
    %c0_i32_0 = arith.constant 0 : i32
    return %arg0, %c0_i32 : i32, i32
  }
  func.func @transform_1(%arg0: i32) -> (i32, i32) {
    %c0_i32 = arith.constant 0 : i32
    %c0_i32_0 = arith.constant 0 : i32
    %c0_i32_1 = arith.constant 0 : i32
    return %c0_i32, %c0_i32_0 : i32, i32
  }
  func.func @transform_2(%arg0: i32) -> (i32, i32) {
    %c0_i32 = arith.constant 0 : i32
    %c0_i32_0 = arith.constant 0 : i32
    %c0_i32_1 = arith.constant 0 : i32
    return %c0_i32, %c0_i32_0 : i32, i32
  }
  func.func @transform_3(%arg0: i32) -> (i32, i32) {
    %c0_i32 = arith.constant 0 : i32
    %c0_i32_0 = arith.constant 0 : i32
    %c0_i32_1 = arith.constant 0 : i32
    return %c0_i32, %c0_i32_0 : i32, i32
  }
  func.func @transform_4(%arg0: i32) -> (i32, i32) {
    %c0_i32 = arith.constant 0 : i32
    %c0_i32_0 = arith.constant 0 : i32
    return %arg0, %c0_i32 : i32, i32
  }
}

</mosaic_0001>

<bundles_post_ra>
// kernel: _lambda_.1
= control target key start
LH: loop header
LB: loop body
LE: loop exit
PB: predicated region body
PF: predicated region fallthrough
CT: control target
= control target key end

     0   :  { %s509_s15 = smov 0   ;;  %s607_s0 = inlined_call_operand.vmem [shape: f32[64,16], index: 0, kind: input, shape index: {}]   ;;  %s608_s1 = inlined_call_operand.vmem [shape: f32[16,128], index: 1, kind: input, shape index: {}]   ;;  %s609_s2 = inlined_call_operand.vmem [shape: f32[128,128], index: 2, kind: input, shape index: {}]   ;;  %s610_s3 = inlined_call_operand.vmem [shape: f32[1,128], index: 3, kind: input, shape index: {}]   ;;  %s611_s4 = inlined_call_operand.vmem [shape: f32[64,128], index: 4, kind: output, shape index: {}]  }
   0x1 LB: > { %s435_s16 = sadd.s32 4294967295, %s481_s15   ;;  %p439_p0 = scmp.ge.s32.totalorder %s481_s15, 1  ;;  %s481_s15 = sphi %s509_s15, %s14_s15  }
   0x2   : > { %p163_p1 = scmp.lt.s32.totalorder %s481_s15, 3 }
   0x4   : > { %p164_p2 = pnand %p439_p0, %p163_p1 }
   0x5   : > { %s440_s17 = sshll.u32 (!%p164_p2), %s435_s16, 2  ;;  %p444_p4 = scmp.ne.s32.totalorder (!%p164_p2), %s435_s16, 0 }
   0x6   : > { %167 = sbr.rel (%p164_p2) target bundleno = 604 (0x25c), region = 36  ;;  %p190_p3 = scmp.lt.s32.totalorder (!%p164_p2), %s440_s17, 7 }
   0xb   : > { %s613_s17 = smov (!%p190_p3, %s440_s17), 7  ;;  %204 = sbr.rel (%p444_p4) target bundleno = 18 (0x12), region = 40 }
   0xc   : > { %s441_s18 = sshll.u32 %s613_s17, 3 }
   0xd   : > { %s520_s21 = scalar_lea.vmem %s607_s0, %s441_s18  ;;  %s525_s24 = scalar_lea.vmem %s611_s4, %s441_s18 }
  0x10   : > { %v483_v0 = vmov 0.0  }
  0x11   : > { %205 = vst [vmem:[#allocation2] sm:$0xff] %v483_v0 }
  0x12 PF: > { %v211_v1 = vld [vmem:[%s608_s1 + $0x8] sm:$0xff]  ;;  %v210_v2 = vld [vmem:[%s608_s1] sm:$0xff]  ;;  %vm216_vm0 = vcmask 130048   ;;  %v277_v4 = vld [vmem:[%s609_s2 + $0x78] sm:$0xff] }
  0x13   : > { %243 = vmatpush.msra.mxu0 %v211_v1  ;;  %v206_v3 = vld [vmem:[%s520_s21] sm:$0xff]  ;;  %v276_v5 = vld [vmem:[%s609_s2 + $0x70] sm:$0xff]  ;;  %280 = vmatpush.msra.mxu1 %v277_v4  ;;  %v275_v6 = vld [vmem:[%s609_s2 + $0x68] sm:$0xff] }
  0x14   : > { %305 = vmatpush.msra.mxu2 %v277_v4  ;;  %330 = vmatpush.msra.mxu3 %v277_v4  ;;  %v274_v7 = vld [vmem:[%s609_s2 + $0x60] sm:$0xff]  ;;  %v273_v8 = vld [vmem:[%s609_s2 + $0x58] sm:$0xff]  ;;  %v207_v9 = vld [vmem:[%s520_s21 + $0x8] sm:$0xff] }
  0x15   : > { %244 = vmatpush.msra.mxu0 %v210_v2  ;;  %281 = vmatpush.msra.mxu1 %v276_v5  ;;  %v272_v10 = vld [vmem:[%s609_s2 + $0x50] sm:$0xff]  ;;  %v271_v11 = vld [vmem:[%s609_s2 + $0x48] sm:$0xff]  ;;  %v270_v12 = vld [vmem:[%s609_s2 + $0x40] sm:$0xff] }
  0x16   : > { %445 = vmatmul.msk.f32.vlgmr.msra.gmra.mxu0 %vm216_vm0, %v206_v3  ;;  %306 = vmatpush.msra.mxu2 %v276_v5  ;;  %v269_v13 = vld [vmem:[%s609_s2 + $0x38] sm:$0xff]  ;;  %v208_v14 = vld [vmem:[%s520_s21 + $0x10] sm:$0xff]  ;;  %v267_v16 = vld [vmem:[%s609_s2 + $0x28] sm:$0xff] }
  0x17   : > { %331 = vmatpush.msra.mxu3 %v276_v5  ;;  %282 = vmatpush.msra.mxu1 %v275_v6  ;;  %v268_v15 = vld [vmem:[%s609_s2 + $0x30] sm:$0xff]  ;;  %v266_v17 = vld [vmem:[%s609_s2 + $0x20] sm:$0xff]  ;;  %v265_v18 = vld [vmem:[%s609_s2 + $0x18] sm:$0xff] }
  0x18   : > { %355 = vmatpush.msrb.mxu0 %v277_v4  ;;  %307 = vmatpush.msra.mxu2 %v275_v6  ;;  %v209_v19 = vld [vmem:[%s520_s21 + $0x18] sm:$0xff]  ;;  %v264_v20 = vld [vmem:[%s609_s2 + $0x10] sm:$0xff]  ;;  %v263_v21 = vld [vmem:[%s609_s2 + $0x8] sm:$0xff] }
  0x19   : > { %332 = vmatpush.msra.mxu3 %v275_v6  ;;  %283 = vmatpush.msra.mxu1 %v274_v7  ;;  %v262_v22 = vld [vmem:[%s609_s2] sm:$0xff] }
  0x1a   : > { %356 = vmatpush.msrb.mxu0 %v276_v5  ;;  %308 = vmatpush.msra.mxu2 %v274_v7  ;;  %v278_v23 = vld [vmem:[#allocation2] sm:$0xff] }
  0x1b   : > { %333 = vmatpush.msra.mxu3 %v274_v7  ;;  %284 = vmatpush.msra.mxu1 %v273_v8  ;;  %v466_v24 = vld [vmem:[%s610_s3] ss:$0 sm:$0xff] }
  0x1c   : > { %357 = vmatpush.msrb.mxu0 %v275_v6  ;;  %309 = vmatpush.msra.mxu2 %v273_v8 }
  0x1d   : > { %334 = vmatpush.msra.mxu3 %v273_v8  ;;  %285 = vmatpush.msra.mxu1 %v272_v10 }
  0x1e   : > { %446 = vmatmul.msk.f32.gmra.mxu0 %vm216_vm0, %v207_v9  ;;  %310 = vmatpush.msra.mxu2 %v272_v10 }
  0x1f   : > { %335 = vmatpush.msra.mxu3 %v272_v10  ;;  %286 = vmatpush.msra.mxu1 %v271_v11 }
  0x20   : > { %358 = vmatpush.msrb.mxu0 %v274_v7  ;;  %311 = vmatpush.msra.mxu2 %v271_v11 }
  0x21   : > { %336 = vmatpush.msra.mxu3 %v271_v11  ;;  %287 = vmatpush.msra.mxu1 %v270_v12 }
  0x22   : > { %359 = vmatpush.msrb.mxu0 %v273_v8  ;;  %312 = vmatpush.msra.mxu2 %v270_v12 }
  0x23   : > { %337 = vmatpush.msra.mxu3 %v270_v12  ;;  %288 = vmatpush.msra.mxu1 %v269_v13 }
  0x24   : > { %360 = vmatpush.msrb.mxu0 %v272_v10  ;;  %313 = vmatpush.msra.mxu2 %v269_v13 }
  0x25   : > { %338 = vmatpush.msra.mxu3 %v269_v13  ;;  %289 = vmatpush.msra.mxu1 %v268_v15 }
  0x26   : > { %447 = vmatmul.msk.f32.gmra.mxu0 %vm216_vm0, %v208_v14  ;;  %314 = vmatpush.msra.mxu2 %v268_v15 }
  0x27   : > { %339 = vmatpush.msra.mxu3 %v268_v15  ;;  %290 = vmatpush.msra.mxu1 %v267_v16 }
  0x28   : > { %361 = vmatpush.msrb.mxu0 %v271_v11  ;;  %315 = vmatpush.msra.mxu2 %v267_v16 }
  0x29   : > { %340 = vmatpush.msra.mxu3 %v267_v16  ;;  %291 = vmatpush.msra.mxu1 %v266_v17 }
  0x2a   : > { %362 = vmatpush.msrb.mxu0 %v270_v12  ;;  %316 = vmatpush.msra.mxu2 %v266_v17 }
  0x2b   : > { %341 = vmatpush.msra.mxu3 %v266_v17  ;;  %292 = vmatpush.msra.mxu1 %v265_v18 }
  0x2c   : > { %363 = vmatpush.msrb.mxu0 %v269_v13  ;;  %317 = vmatpush.msra.mxu2 %v265_v18 }
  0x2d   : > { %342 = vmatpush.msra.mxu3 %v265_v18  ;;  %293 = vmatpush.msra.mxu1 %v264_v20 }
  0x2e   : > { %448 = vmatmul.msk.f32.gmra.mxu0 %vm216_vm0, %v209_v19  ;;  %318 = vmatpush.msra.mxu2 %v264_v20 }
  0x2f   : > { %343 = vmatpush.msra.mxu3 %v264_v20  ;;  %294 = vmatpush.msra.mxu1 %v263_v21 }
  0x30   : > { %364 = vmatpush.msrb.mxu0 %v268_v15  ;;  %319 = vmatpush.msra.mxu2 %v263_v21 }
  0x31   : > { %344 = vmatpush.msra.mxu3 %v263_v21  ;;  %295 = vmatpush.msra.mxu1 %v262_v22 }
  0x32   : > { %365 = vmatpush.msrb.mxu0 %v267_v16  ;;  %296 = vmatmul.f32.vlgmr.msra.gmra.mxu1 %v278_v23 }
  0x33   : > { %320 = vmatpush.msra.mxu2 %v262_v22  ;;  %345 = vmatpush.msra.mxu3 %v262_v22 }
  0x34   : > { %366 = vmatpush.msrb.mxu0 %v266_v17 }
  0x36   : > { %367 = vmatpush.msrb.mxu0 %v265_v18 }
  0x38   : > { %368 = vmatpush.msrb.mxu0 %v264_v20 }
  0x3a   : > { %369 = vmatpush.msrb.mxu0 %v263_v21 }
  0x3c   : > { %370 = vmatpush.msrb.mxu0 %v262_v22 }
  0x93   : > { %v246_v25 = vpop.f32.mrf.mxu0 }
  0x94   : > { %v247_v26 = vadd.f32 %v466_v24, %v246_v25 }
  0x96   : > { %258 = vst [vmem:[%s525_s24] sm:$0xff] %v247_v26 }
  0x9b   : > { %v249_v27 = vpop.f32.mrf.mxu0 }
  0x9c   : > { %v250_v28 = vadd.f32 %v466_v24, %v249_v27 }
  0x9d   : > { %v279_v34 = vld [vmem:[%s525_s24] sm:$0xff] }
  0x9e   : > { %259 = vst [vmem:[%s525_s24 + $0x8] sm:$0xff] %v250_v28 }
  0xa3   : > { %v252_v29 = vpop.f32.mrf.mxu0 }
  0xa4   : > { %v253_v30 = vadd.f32 %v466_v24, %v252_v29 }
  0xa5   : > { %v449_v37 = vld [vmem:[%s525_s24 + $0x8] sm:$0xff] }
  0xa6   : > { %260 = vst [vmem:[%s525_s24 + $0x10] sm:$0xff] %v253_v30 }
  0xab   : > { %v255_v31 = vpop.f32.mrf.mxu0 }
  0xac   : > { %v256_v32 = vadd.f32 %v466_v24, %v255_v31 }
  0xad   : > { %v451_v41 = vld [vmem:[%s525_s24 + $0x10] sm:$0xff] }
  0xae   : > { %261 = vst [vmem:[%s525_s24 + $0x18] sm:$0xff] %v256_v32 }
  0xaf   : > { %v297_v33 = vpop.f32.mrf.mxu1 }
  0xb0   : > { %v300_v35 = vadd.f32 %v297_v33, %v279_v34 }
  0xb2   : > { %467 = vtanh.f32 %v300_v35 }
  0xb5   : > { %v453_v45 = vld [vmem:[%s525_s24 + $0x18] sm:$0xff] }
  0xb8   : > { %v468_v36 = vpop.eup %467 }
  0xb9   : > { %302 = vst [vmem:[%s525_s24] sm:$0xff] %v468_v36  ;;  %321 = vmatmul.f32.vlgmr.msra.gmra.mxu2 %v468_v36 }
 0x13c   : > { %v322_v38 = vpop.f32.mrf.mxu2 }
 0x13d   : > { %v325_v39 = vadd.f32 %v449_v37, %v322_v38 }
 0x13f   : > { %469 = vtanh.f32 %v325_v39 }
 0x145   : > { %v470_v40 = vpop.eup %469 }
 0x146   : > { %450 = vst [vmem:[%s525_s24 + $0x8] sm:$0xff] %v470_v40  ;;  %346 = vmatmul.f32.vlgmr.msra.gmra.mxu3 %v470_v40 }
 0x1c9   : > { %v347_v42 = vpop.f32.mrf.mxu3 }
 0x1ca   : > { %v350_v43 = vadd.f32 %v451_v41, %v347_v42 }
 0x1cc   : > { %471 = vtanh.f32 %v350_v43 }
 0x1d2   : > { %v472_v44 = vpop.eup %471 }
 0x1d3   : > { %452 = vst [vmem:[%s525_s24 + $0x10] sm:$0xff] %v472_v44  ;;  %371 = vmatmul.f32.vlgmr.msrb.gmra.mxu0 %v472_v44 }
 0x250   : > { %v372_v46 = vpop.f32.mrf.mxu0 }
 0x251   : > { %v375_v47 = vadd.f32 %v453_v45, %v372_v46 }
 0x253   : > { %473 = vtanh.f32 %v375_v47 }
 0x259   : > { %v474_v48 = vpop.eup %473 }
 0x25a   : > { %454 = vst [vmem:[%s525_s24 + $0x18] sm:$0xff] %v474_v48 }
 0x25b   : > { %378 = vst [vmem:[#allocation2] sm:$0xff] %v474_v48 }
 0x25c PF: > { %s14_s15 = sadd.s32 1, %s481_s15  }
 0x25d   : > { %p11_p5 = scmp.ge.s32.totalorder %s14_s15, 4  }
 0x25f   :  { %13 = sbr.rel (!%p11_p5) target bundleno = 1 (0x1), region = 73 }

</bundles_post_ra>
